<compile_context>
chip_gen: v7x
topology: tpu7x:2x2x1
jax: 0.10.0
libtpu: 0.0.40
codegen_flags: <defaults>
</compile_context>

<pallas_src>
import jax
import jax.numpy as jnp
from jax.experimental import pallas as pl
from jax.experimental.pallas import tpu as pltpu


def _round_up(v, m):
    return (v + m - 1) // m * m


def _pad2(a, rows, cols):
    pr, pc = rows - a.shape[0], cols - a.shape[1]
    if pr == 0 and pc == 0:
        return a
    return jnp.pad(a, ((0, pr), (0, pc)))


def _vmem_capacity_bytes():
    try:
        return int(pltpu.get_tpu_info().vmem_capacity_bytes)
    except Exception:
        return 128 << 20  # conservative fallback (v5e/v6e physical VMEM)


def ffn_kernel(x_ref, w1_ref, b1_ref, w2_ref, b2_ref, o_ref, acc_ref):
    """One (row-tile, hidden-K-tile) step of the fused FFN.

    h_k = relu(x @ W1[:, k-tile] + b1[k-tile])     (bf16 MXU, f32 accumulate)
    acc += h_k.bf16 @ W2[k-tile, :]                (bf16 MXU, f32 accumulate)
    at the last k-tile: out = acc + b2
    """
    k = pl.program_id(1)

    @pl.when(k == 0)
    def _():
        acc_ref[...] = jnp.zeros_like(acc_ref)

    h = jnp.dot(x_ref[...], w1_ref[...], preferred_element_type=jnp.float32)
    h = jnp.maximum(h + b1_ref[...], 0.0)
    # dropout_rate = 0 (and eval mode) => dropout is the identity.
    # TODO(synk): training-mode dropout with p > 0 would need pltpu.prng_* masking here.
    acc_ref[...] += jnp.dot(h.astype(jnp.bfloat16), w2_ref[...],
                            preferred_element_type=jnp.float32)

    @pl.when(k == pl.num_programs(1) - 1)
    def _():
        o_ref[...] = (acc_ref[...] + b2_ref[...]).astype(o_ref.dtype)


def prepare_ffn_params(w1, b1, w2, b2, *, tk=None):
    """Pad + cast the weights ONCE (hoisted out of the per-call wrapper).

    w1: [D_in, H]; b1: [H]; w2: [H, D_out]; b2: [D_out]
    """
    D_in, H = w1.shape
    D_out = w2.shape[1]

    D_in_p = _round_up(D_in, 128)
    D_out_p = _round_up(D_out, 128)

    # Hidden dim is K-streamed in tiles of `tk`; prefer 256-multiples (the
    # v6e/v7x MXU is 256 wide). Small H collapses to a single K step.
    H_p = _round_up(H, 256) if H > 128 else _round_up(H, 128)
    if tk is None:
        if H_p <= 1024:
            tk = H_p
        else:
            tk = 512 if H_p % 512 == 0 else 256
    assert H_p % tk == 0

    return dict(
        w1=_pad2(w1, D_in_p, H_p).astype(jnp.bfloat16),
        w2=_pad2(w2, H_p, D_out_p).astype(jnp.bfloat16),
        b1=jnp.pad(b1, (0, H_p - H)).reshape(1, H_p).astype(jnp.float32),
        b2=jnp.pad(b2, (0, D_out_p - D_out)).reshape(1, D_out_p).astype(jnp.float32),
        dims=(D_in, H, D_out, D_in_p, H_p, D_out_p, tk),
    )


def feed_forward_network(x, params, *, tm=None, out_dtype=None):
    """x: [M, D_in] -> [M, D_out]; params from prepare_ffn_params."""
    M, D_in = x.shape
    d_in, _, D_out, D_in_p, H_p, D_out_p, tk = params["dims"]
    assert D_in == d_in
    out_dtype = x.dtype if out_dtype is None else out_dtype

    # Row tile: multiple of 16 (bf16 sublane packing). Prefer >= 2 row tiles so
    # the "parallel" row axis can shard across v7x's two TensorCores.
    if tm is None:
        tm = min(256, _round_up(M, 16))
    M_p = _round_up(M, tm)
    while M_p // tm < 2 and tm > 16:
        tm = _round_up(max(16, tm // 2), 16)
        M_p = _round_up(M, tm)

    # Stream x as bf16 (halves the only per-step input DMA besides the output).
    xp = _pad2(x, M_p, D_in_p).astype(jnp.bfloat16)

    n_row = M_p // tm
    n_k = H_p // tk
    grid = (n_row, n_k)

    # VMEM budget: double-buffered streamed tiles + f32 accumulator, clamped
    # per-generation to ~80% of physical VMEM (v7x 64 MiB -> ~51 MiB cap;
    # v5e/v6e 128 MiB -> ~102 MiB). Explicit limit matters on v5e (16 MiB
    # scoped default).
    vmem_need = (
        2 * tm * D_in_p * 2                       # x tile (bf16, double-buffered)
        + 2 * tm * D_out_p * 4                    # out tile (f32, double-buffered)
        + 2 * (D_in_p * tk + tk * D_out_p) * 2    # bf16 W1/W2 K-tiles, double-buffered
        + 2 * (tk + D_out_p) * 4                  # bias tiles
        + tm * D_out_p * 4                        # f32 accumulator scratch
        + tm * tk * 4                             # f32 hidden intermediate headroom
    )
    vmem_cap = int(0.8 * _vmem_capacity_bytes())
    vmem_limit = max(min(int(1.5 * vmem_need) + (2 << 20), vmem_cap), 16 << 20)

    cost = pl.CostEstimate(
        flops=2 * M_p * (D_in_p * H_p + H_p * D_out_p),
        transcendentals=0,
        bytes_accessed=(xp.size * 2
                        + n_row * (params["w1"].size * 2 + params["w2"].size * 2
                                   + params["b1"].size * 4 + params["b2"].size * 4)
                        + M_p * D_out_p * jnp.dtype(out_dtype).itemsize),
    )

    out_p = pl.pallas_call(
        ffn_kernel,
        out_shape=jax.ShapeDtypeStruct((M_p, D_out_p), out_dtype),
        grid_spec=pltpu.PrefetchScalarGridSpec(
            num_scalar_prefetch=0,
            grid=grid,
            in_specs=[
                pl.BlockSpec((tm, D_in_p), lambda i, k: (i, 0)),    # x row tile (bf16)
                pl.BlockSpec((D_in_p, tk), lambda i, k: (0, k)),    # W1 K-tile (bf16)
                pl.BlockSpec((1, tk), lambda i, k: (0, k)),         # b1 K-tile (f32)
                pl.BlockSpec((tk, D_out_p), lambda i, k: (k, 0)),   # W2 K-tile (bf16)
                pl.BlockSpec((1, D_out_p), lambda i, k: (0, 0)),    # b2 (f32)
            ],
            out_specs=pl.BlockSpec((tm, D_out_p), lambda i, k: (i, 0)),
            scratch_shapes=[pltpu.VMEM((tm, D_out_p), jnp.float32)],
        ),
        compiler_params=pltpu.CompilerParams(
            dimension_semantics=("parallel", "arbitrary"),
            vmem_limit_bytes=vmem_limit,
        ),
        cost_estimate=cost,
    )(xp, params["w1"], params["b1"], params["w2"], params["b2"])

    return out_p[:M, :D_out]


if __name__ == "__main__":
    # Module config (small, consistent with the forward pass).
    batch, seq = 2, 8
    input_size, hidden_size, output_size = 32, 64, 32

    key = jax.random.PRNGKey(0)
    kx, kw1, kb1, kw2, kb2 = jax.random.split(key, 5)

    x = jax.random.normal(kx, (batch, seq, input_size), dtype=jnp.float32)
    lim1 = 1.0 / (input_size ** 0.5)
    lim2 = 1.0 / (hidden_size ** 0.5)
    # PyTorch stores Linear weight as [out, in]; sample that way then transpose.
    w1_pt = jax.random.uniform(kw1, (hidden_size, input_size), jnp.float32, -lim1, lim1)
    b1 = jax.random.uniform(kb1, (hidden_size,), jnp.float32, -lim1, lim1)
    w2_pt = jax.random.uniform(kw2, (output_size, hidden_size), jnp.float32, -lim2, lim2)
    b2 = jax.random.uniform(kb2, (output_size,), jnp.float32, -lim2, lim2)
    w1 = w1_pt.T  # [D_in, H]
    w2 = w2_pt.T  # [H, D_out]

    # Weight prep hoisted: done once, reused by every forward call.
    params = prepare_ffn_params(w1, b1, w2, b2)

    # jit the apply so the x pad/cast fuses; params are closed over (constants).
    apply = jax.jit(lambda xx: feed_forward_network(xx, params))

    # Flatten leading dims (nn.Linear acts on the last dim).
    x2d = x.reshape(-1, input_size)

    out2d = apply(x2d)
    out = out2d.reshape(batch, seq, output_size)
    jax.block_until_ready(out)

    # bf16-matched reference (same dtype path as the kernel).
    h_ref = jnp.maximum(
        jnp.dot(x2d.astype(jnp.bfloat16), w1.astype(jnp.bfloat16),
                preferred_element_type=jnp.float32) + b1, 0.0)
    ref_bf16 = (jnp.dot(h_ref.astype(jnp.bfloat16), w2.astype(jnp.bfloat16),
                        preferred_element_type=jnp.float32) + b2
                ).reshape(batch, seq, output_size)
    # Full-f32 reference (module semantics), checked at bf16-level tolerance.
    ref_f32 = jnp.maximum(x @ w1 + b1, 0.0) @ w2 + b2

    assert out.shape == (batch, seq, output_size)
    assert jnp.allclose(out, ref_bf16, atol=2e-3, rtol=2e-2), "mismatch vs bf16 reference"
    assert jnp.allclose(out, ref_f32, atol=5e-2, rtol=5e-2), "mismatch vs f32 reference"

    print("KERNEL_OK")
</pallas_src>

<mosaic_0001>
module attributes {stable_mosaic.version = 11 : i64} {
  func.func @ffn_kernel(%arg0: i32, %arg1: i32, %arg2: memref<16x128xbf16, #tpu.memory_space<vmem>>, %arg3: memref<128x128xbf16, #tpu.memory_space<vmem>>, %arg4: memref<1x128xf32, #tpu.memory_space<vmem>>, %arg5: memref<128x128xbf16, #tpu.memory_space<vmem>>, %arg6: memref<1x128xf32, #tpu.memory_space<vmem>>, %arg7: memref<16x128xf32, #tpu.memory_space<vmem>>, %arg8: memref<16x128xf32, #tpu.memory_space<vmem>>) attributes {dimension_semantics = [#tpu.dimension_semantics<parallel>, #tpu.dimension_semantics<arbitrary>], iteration_bounds = array<i64: 1, 1>, scalar_prefetch = 0 : i64, scratch_operands = 1 : i64, tpu.core_type = #tpu.core_type<tc>, window_params = [{transform_indices = @transform_0, window_bounds = array<i64: 16, 128>}, {transform_indices = @transform_1, window_bounds = array<i64: 128, 128>}, {transform_indices = @transform_2, window_bounds = array<i64: 1, 128>}, {transform_indices = @transform_3, window_bounds = array<i64: 128, 128>}, {pipeline_mode = #tpu.pipeline_mode<synchronous>, transform_indices = @transform_4, window_bounds = array<i64: 1, 128>}, {transform_indices = @transform_5, window_bounds = array<i64: 16, 128>}]} {
    %c0_i32 = arith.constant 0 : i32
    %0 = arith.cmpi eq, %arg1, %c0_i32 : i32
    %1 = arith.extui %0 : i1 to i32
    %c0_i32_0 = arith.constant 0 : i32
    %2 = arith.cmpi ne, %1, %c0_i32_0 : i32
    scf.if %2 {
      %cst_16 = arith.constant 0.000000e+00 : f32
      %20 = vector.broadcast %cst_16 : f32 to vector<16x128xf32>
      %c0_17 = arith.constant 0 : index
      %c0_18 = arith.constant 0 : index
      %21 = vector.load %arg8[%c0_17, %c0_18] : memref<16x128xf32, #tpu.memory_space<vmem>>, vector<16x128xf32>
      tpu.vector_store %arg8[%c0_17, %c0_18], %20 {strides = array<i32>} : memref<16x128xf32, #tpu.memory_space<vmem>>, vector<16x128xf32>,
    } else {
    }
    %c0 = arith.constant 0 : index
    %c0_1 = arith.constant 0 : index
    %3 = vector.load %arg2[%c0, %c0_1] : memref<16x128xbf16, #tpu.memory_space<vmem>>, vector<16x128xbf16>
    %c0_2 = arith.constant 0 : index
    %c0_3 = arith.constant 0 : index
    %4 = vector.load %arg3[%c0_2, %c0_3] : memref<128x128xbf16, #tpu.memory_space<vmem>>, vector<128x128xbf16>
    %cst = arith.constant dense<0.000000e+00> : vector<16x128xf32>
    %5 = tpu.matmul %3, %4, %cst {dimension_numbers = #tpu.dot_dimension_numbers<[1], [0], [0], [1], [0, 0, 1, 1], [], []>} : vector<16x128xbf16>, vector<128x128xbf16>, vector<16x128xf32> -> vector<16x128xf32>
    %c0_4 = arith.constant 0 : index
    %c0_5 = arith.constant 0 : index
    %6 = vector.load %arg4[%c0_4, %c0_5] : memref<1x128xf32, #tpu.memory_space<vmem>>, vector<1x128xf32>
    %7 = vector.broadcast %6 : vector<1x128xf32> to vector<16x128xf32>
    %8 = arith.addf %5, %7 : vector<16x128xf32>
    %cst_6 = arith.constant 0.000000e+00 : f32
    %9 = vector.broadcast %cst_6 : f32 to vector<16x128xf32>
    %10 = arith.maximumf %8, %9 : vector<16x128xf32>
    %c0_7 = arith.constant 0 : index
    %c0_8 = arith.constant 0 : index
    %11 = vector.load %arg8[%c0_7, %c0_8] : memref<16x128xf32, #tpu.memory_space<vmem>>, vector<16x128xf32>
    %12 = arith.truncf %10 : vector<16x128xf32> to vector<16x128xbf16>
    %c0_9 = arith.constant 0 : index
    %c0_10 = arith.constant 0 : index
    %13 = vector.load %arg5[%c0_9, %c0_10] : memref<128x128xbf16, #tpu.memory_space<vmem>>, vector<128x128xbf16>
    %cst_11 = arith.constant dense<0.000000e+00> : vector<16x128xf32>
    %14 = tpu.matmul %12, %13, %cst_11 {dimension_numbers = #tpu.dot_dimension_numbers<[1], [0], [0], [1], [0, 0, 1, 1], [], []>} : vector<16x128xbf16>, vector<128x128xbf16>, vector<16x128xf32> -> vector<16x128xf32>
    %15 = arith.addf %11, %14 : vector<16x128xf32>
    %c0_12 = arith.constant 0 : index
    %c0_13 = arith.constant 0 : index
    %16 = vector.load %arg8[%c0_12, %c0_13] : memref<16x128xf32, #tpu.memory_space<vmem>>, vector<16x128xf32>
    tpu.vector_store %arg8[%c0_12, %c0_13], %15 {strides = array<i32>} : memref<16x128xf32, #tpu.memory_space<vmem>>, vector<16x128xf32>,
    %c0_i32_14 = arith.constant 0 : i32
    %17 = arith.cmpi eq, %arg1, %c0_i32_14 : i32
    %18 = arith.extui %17 : i1 to i32
    %c0_i32_15 = arith.constant 0 : i32
    %19 = arith.cmpi ne, %18, %c0_i32_15 : i32
    scf.if %19 {
      %c0_16 = arith.constant 0 : index
      %c0_17 = arith.constant 0 : index
      %20 = vector.load %arg8[%c0_16, %c0_17] : memref<16x128xf32, #tpu.memory_space<vmem>>, vector<16x128xf32>
      %c0_18 = arith.constant 0 : index
      %c0_19 = arith.constant 0 : index
      %21 = vector.load %arg6[%c0_18, %c0_19] : memref<1x128xf32, #tpu.memory_space<vmem>>, vector<1x128xf32>
      %22 = vector.broadcast %21 : vector<1x128xf32> to vector<16x128xf32>
      %23 = arith.addf %20, %22 : vector<16x128xf32>
      %c0_20 = arith.constant 0 : index
      %c0_21 = arith.constant 0 : index
      %24 = vector.load %arg7[%c0_20, %c0_21] : memref<16x128xf32, #tpu.memory_space<vmem>>, vector<16x128xf32>
      tpu.vector_store %arg7[%c0_20, %c0_21], %23 {strides = array<i32>} : memref<16x128xf32, #tpu.memory_space<vmem>>, vector<16x128xf32>,
    } else {
    }
    return
  }
  func.func @transform_0(%arg0: i32, %arg1: i32) -> (i32, i32) {
    %c0_i32 = arith.constant 0 : i32
    %c0_i32_0 = arith.constant 0 : i32
    return %arg0, %c0_i32 : i32, i32
  }
  func.func @transform_1(%arg0: i32, %arg1: i32) -> (i32, i32) {
    %c0_i32 = arith.constant 0 : i32
    %c0_i32_0 = arith.constant 0 : i32
    return %c0_i32, %arg1 : i32, i32
  }
  func.func @transform_2(%arg0: i32, %arg1: i32) -> (i32, i32) {
    %c0_i32 = arith.constant 0 : i32
    %c0_i32_0 = arith.constant 0 : i32
    return %c0_i32, %arg1 : i32, i32
  }
  func.func @transform_3(%arg0: i32, %arg1: i32) -> (i32, i32) {
    %c0_i32 = arith.constant 0 : i32
    %c0_i32_0 = arith.constant 0 : i32
    return %arg1, %c0_i32 : i32, i32
  }
  func.func @transform_4(%arg0: i32, %arg1: i32) -> (i32, i32) {
    %c0_i32 = arith.constant 0 : i32
    %c0_i32_0 = arith.constant 0 : i32
    %c0_i32_1 = arith.constant 0 : i32
    return %c0_i32, %c0_i32_0 : i32, i32
  }
  func.func @transform_5(%arg0: i32, %arg1: i32) -> (i32, i32) {
    %c0_i32 = arith.constant 0 : i32
    %c0_i32_0 = arith.constant 0 : i32
    return %arg0, %c0_i32 : i32, i32
  }
}

</mosaic_0001>

<bundles_post_ra>
// kernel: _lambda_.1
= control target key start
LH: loop header
LB: loop body
LE: loop exit
PB: predicated region body
PF: predicated region fallthrough
CT: control target
= control target key end

     0   :  { %10 = vsyncpa [#allocation4], 0  ;;  %s554_s0 = inlined_call_operand.vmem [shape: bf16[16,128], index: 0, kind: input, shape index: {}]   ;;  %s555_s1 = inlined_call_operand.hbm [shape: bf16[128,128], index: 1, kind: input, shape index: {}]   ;;  %s556_s2 = inlined_call_operand.vmem [shape: f32[1,128], index: 2, kind: input, shape index: {}]   ;;  %s557_s3 = inlined_call_operand.vmem [shape: bf16[128,128], index: 3, kind: input, shape index: {}]   ;;  %s558_s4 = inlined_call_operand.vmem [shape: f32[1,128], index: 4, kind: input, shape index: {}]   ;;  %s559_s5 = inlined_call_operand.hbm [shape: f32[16,128], index: 5, kind: output, shape index: {}]  }
   0x1   :  { %11 = vsyncpa [#allocation5], 0  ;;  %s459_s18 = smov [#allocation3]   ;;  %s411_s22 = scalar_lea.hbm %s555_s1, 1024 }
   0x2   :  { %s19_s19 = sshll.u32 %s459_s18, 4  ;;  %p412_p0 = scmp.ne.s32.totalorder %s555_s1, %s411_s22  ;;  %s20_s19 = int_to_ptr.vmem [resolvable:$true] %s19_s19 }
   0x3   :  { %p415_p1 = scmp.lt.u32.totalorder %s411_s22, %s555_s1 }
   0x5   :  { %p417_p2 = pnand %p415_p1, %p412_p0 }
   0x7   :  { %420 = shalt.err (!%p417_p2)
}
   0x8   :  { %s421_s27 = scalar_lea.vmem %s20_s19, 1024  ;;  %p426_p4 = scmp.lt.s32.totalorder %s20_s19, %s20_s19 }
   0x9   :  { %p422_p3 = scmp.ne.s32.totalorder %s20_s19, %s421_s27  ;;  %p427_p5 = scmp.lt.s32.totalorder %s421_s27, %s421_s27 }
   0xb   :  { %p428_p6 = por %p427_p5, %p426_p4 }
   0xd   :  { %p429_p7 = pnand %p428_p6, %p422_p3 }
   0xf   :  { %432 = shalt.err (!%p429_p7)
}
  0x10   :  { %s460_s28 = smov 64   ;;  %s461_s29 = smov 4  }
  0x11   :  { %25 = dma.hbm_to_vmem [thread:$0]  %s555_s1, 1024, %s20_s19, [#allocation4], %s460_s28, %s460_s28, %s461_s29  }
  0x12   :  { %455 = dma.done.wait [#allocation4], 1024  }
  0x13   :  { %456 = vsyncadd [#allocation4], 4294966272  ;;  %v462_v0 = vmov 0.0   ;;  %vm463_vm0 = vmmov 0   ;;  %v394_v1 = vld [vmem:[#allocation3] sm:$0xff]   ;;  %v395_v2 = vld [vmem:[#allocation3 + $0x8] sm:$0xff]  }
  0x14   :  { %346 = vmatprep.subr.bf16.mxu0 %v462_v0  ;;  %362 = vmatprep.mubr.msk.bf16.mxu0 %vm463_vm0, %v462_v0  ;;  %v396_v3 = vld [vmem:[#allocation3 + $0x10] sm:$0xff]   ;;  %v403_v4 = vld [vmem:[%s557_s3] sm:$0xff]   ;;  %v397_v5 = vld [vmem:[#allocation3 + $0x18] sm:$0xff]  }
  0x15   :  { %366 = vmatprep.subr.bf16.mxu1 %v462_v0  ;;  %382 = vmatprep.mubr.msk.bf16.mxu1 %vm463_vm0, %v462_v0  ;;  %v404_v6 = vld [vmem:[%s557_s3 + $0x8] sm:$0xff]   ;;  %v398_v7 = vld [vmem:[#allocation3 + $0x20] sm:$0xff]   ;;  %v405_v8 = vld [vmem:[%s557_s3 + $0x10] sm:$0xff]  }
  0x16   :  { %347 = vmatpush3.bf16.msra.mxu0 %v394_v1  ;;  %367 = vmatpush3.bf16.msra.mxu1 %v403_v4  ;;  %v399_v9 = vld [vmem:[#allocation3 + $0x28] sm:$0xff]   ;;  %v406_v10 = vld [vmem:[%s557_s3 + $0x18] sm:$0xff]   ;;  %v400_v11 = vld [vmem:[#allocation3 + $0x30] sm:$0xff]  }
  0x17   :  { %348 = vmatprep.subr.bf16.mxu0 %v462_v0  ;;  %368 = vmatprep.subr.bf16.mxu1 %v462_v0  ;;  %v407_v12 = vld [vmem:[%s557_s3 + $0x20] sm:$0xff]   ;;  %v401_v13 = vld [vmem:[#allocation3 + $0x38] sm:$0xff]   ;;  %v408_v14 = vld [vmem:[%s557_s3 + $0x28] sm:$0xff]  }
  0x18   :  { %v402_v15 = vld [vmem:[%s554_s0] sm:$0xff]   ;;  %v409_v16 = vld [vmem:[%s557_s3 + $0x30] sm:$0xff]   ;;  %v410_v17 = vld [vmem:[%s557_s3 + $0x38] sm:$0xff]   ;;  %s464_s3 = smov [#allocation6]  }
  0x19   :  { %v309_v18 = vld [vmem:[%s556_s2] ss:$0 sm:$0xff]  ;;  %s297_s27 = sshll.u32 %s464_s3, 4  ;;  %s298_s27 = int_to_ptr.vmem [resolvable:$true] %s297_s27 }
  0x1a   :  { %349 = vmatpush3.bf16.msra.mxu0 %v395_v2  ;;  %369 = vmatpush3.bf16.msra.mxu1 %v404_v6  ;;  %v327_v28 = vld [vmem:[%s558_s4] ss:$0 sm:$0xff]  ;;  %s433_s2 = scalar_lea.vmem %s298_s27, 256  ;;  %p438_p9 = scmp.lt.s32.totalorder %s298_s27, %s298_s27 }
  0x1b   :  { %350 = vmatprep.subr.bf16.mxu0 %v462_v0  ;;  %370 = vmatprep.subr.bf16.mxu1 %v462_v0  ;;  %p434_p8 = scmp.ne.s32.totalorder %s298_s27, %s433_s2  ;;  %p439_p10 = scmp.lt.s32.totalorder %s433_s2, %s433_s2 }
  0x1d   :  { %p440_p11 = por %p439_p10, %p438_p9 }
  0x1e   :  { %351 = vmatpush3.bf16.msra.mxu0 %v396_v3  ;;  %371 = vmatpush3.bf16.msra.mxu1 %v405_v8 }
  0x1f   :  { %352 = vmatprep.subr.bf16.mxu0 %v462_v0  ;;  %372 = vmatprep.subr.bf16.mxu1 %v462_v0  ;;  %p441_p12 = pnand %p440_p11, %p434_p8 }
  0x22   :  { %353 = vmatpush3.bf16.msra.mxu0 %v397_v5  ;;  %373 = vmatpush3.bf16.msra.mxu1 %v406_v10 }
  0x23   :  { %354 = vmatprep.subr.bf16.mxu0 %v462_v0  ;;  %374 = vmatprep.subr.bf16.mxu1 %v462_v0 }
  0x26   :  { %355 = vmatpush3.bf16.msra.mxu0 %v398_v7  ;;  %375 = vmatpush3.bf16.msra.mxu1 %v407_v12 }
  0x27   :  { %356 = vmatprep.subr.bf16.mxu0 %v462_v0  ;;  %376 = vmatprep.subr.bf16.mxu1 %v462_v0 }
  0x2a   :  { %357 = vmatpush3.bf16.msra.mxu0 %v399_v9  ;;  %377 = vmatpush3.bf16.msra.mxu1 %v408_v14 }
  0x2b   :  { %358 = vmatprep.subr.bf16.mxu0 %v462_v0  ;;  %378 = vmatprep.subr.bf16.mxu1 %v462_v0 }
  0x2e   :  { %359 = vmatpush3.bf16.msra.mxu0 %v400_v11  ;;  %379 = vmatpush3.bf16.msra.mxu1 %v409_v16 }
  0x2f   :  { %360 = vmatprep.subr.bf16.mxu0 %v462_v0  ;;  %380 = vmatprep.subr.bf16.mxu1 %v462_v0 }
  0x32   :  { %361 = vmatpush3.bf16.msra.mxu0 %v401_v13  ;;  %381 = vmatpush3.bf16.msra.mxu1 %v410_v17 }
  0x35   :  { %363 = vmatmul.mubr.bf16.vlgmr.msra.gmra.mrb[0].mxu0 %v402_v15 }
 0x108   :  { %v155_v19 = vpop.f32.mrb[0].mxu0 }
 0x109   :  { %v156_v20 = vadd.f32 %v309_v18, %v155_v19  ;;  %v364_v21 = vpop.f32.mrb[1].mxu0 }
 0x10a   :  { %v158_v22 = vpop.f32.mrb[2].mxu0 }
 0x10b   :  { %v159_v23 = vadd.f32 %v309_v18, %v158_v22  ;;  %v365_v24 = vpop.f32.mrb[3].mxu0  ;;  %v162_v25 = vmax.f32 %v156_v20, 0.0 }
 0x10d   :  { %v163_v26 = vmax.f32 %v159_v23, 0.0 }
 0x10f   :  { %v166_v27 = vpack.c.bf16 %v163_v26, %v162_v25 }
 0x111   :  { %383 = vmatmul.mubr.bf16.vlgmr.msra.gmra.mrb[0].mxu1 %v166_v27 }
 0x1e4   :  { %v265_v29 = vpop.f32.mrb[0].mxu1 }
 0x1e5   :  { %v288_v30 = vadd.f32 %v327_v28, %v265_v29  ;;  %v384_v31 = vpop.f32.mrb[1].mxu1 }
 0x1e6   :  { %v268_v32 = vpop.f32.mrb[2].mxu1 }
 0x1e7   :  { %290 = vst [vmem:[#allocation6] sm:$0xff] %v288_v30  ;;  %v289_v33 = vadd.f32 %v327_v28, %v268_v32  ;;  %v385_v34 = vpop.f32.mrb[3].mxu1 }
 0x1e9   :  { %291 = vst [vmem:[#allocation6 + $0x8] sm:$0xff] %v289_v33 }
 0x1ea   :  { %444 = shalt.err (!%p441_p12)
}
 0x1eb   :  { %s445_s29 = scalar_lea.hbm %s559_s5, 256 }
 0x1ec   :  { %p446_p13 = scmp.ne.s32.totalorder %s559_s5, %s445_s29  ;;  %p449_p0 = scmp.lt.u32.totalorder %s445_s29, %s559_s5 }
 0x1ee   :  { %p451_p1 = pnand %p449_p0, %p446_p13 }
 0x1f0   :  { %454 = shalt.err (!%p451_p1)
}
 0x1f1   :  { %s465_s1 = smov 128   ;;  %s466_s9 = smov 8  }
 0x1f2   :  { %303 = dma.vmem_to_hbm [thread:$0]  %s298_s27, 256, %s559_s5, [#allocation5], %s465_s1, %s465_s1, %s466_s9  }
 0x1f3   :  { %457 = dma.done.wait [#allocation5], 256  }
 0x1f4   :  { %458 = vsyncadd [#allocation5], 4294967040 }
 0x1f5   :  { %307 = vsyncpa [#allocation4], 1 }
 0x1f6   :  { %308 = vsyncpa [#allocation5], 1 }

</bundles_post_ra>
